<compile_context>
chip_gen: v7x
topology: tpu7x:2x2x1
jax: 0.10.0
libtpu: 0.0.40
codegen_flags: <defaults>
</compile_context>

<pallas_src>
import jax
import jax.numpy as jnp
from jax.experimental import pallas as pl
from jax.experimental.pallas import tpu as pltpu


def _cdiv(a, b):
    return -(-a // b)


def _round_up(v, m):
    return _cdiv(v, m) * m


def _adapter_kernel(x_ref, w1t_ref, w2t_ref, o_ref):
    # x_ref  : (TM, C_pad)    rows x features (feature dim on lanes)
    # w1t_ref: (C_pad, H_pad) W1^T  -- resident across grid steps
    # w2t_ref: (H_pad, C_pad) W2^T  -- resident across grid steps
    x = x_ref[...]

    # h = ReLU(x @ W1^T): canonical (M,K)x(K,N) contraction, f32 accumulate.
    h = jnp.dot(x, w1t_ref[...], preferred_element_type=jnp.float32)
    h = jnp.maximum(h, 0.0)

    # y = ReLU(h @ W2^T)
    y = jnp.dot(h.astype(w2t_ref.dtype), w2t_ref[...],
                preferred_element_type=jnp.float32)
    y = jnp.maximum(y, 0.0)

    o_ref[...] = y.astype(o_ref.dtype)


def _choose_row_tiling(m, c_pad, h_pad, x_itemsize, w_itemsize, out_itemsize,
                       vmem_budget, tm_max):
    """Pick the row tile from a VMEM budget; balance the tail; >=2 grid steps
    for megacore when there is enough work."""
    # Default BlockSpec pipelining double-buffers every input/output block.
    weight_bytes = 2 * 2 * c_pad * h_pad * w_itemsize          # W1^T + W2^T
    per_row = (2 * c_pad * x_itemsize        # x tile, double-buffered
               + 2 * c_pad * out_itemsize    # out tile, double-buffered
               + 4 * h_pad                   # f32 hidden intermediate
               + 4 * c_pad)                  # f32 result before downcast
    avail = max(vmem_budget - weight_bytes, 8 * per_row)
    tm_cap = max(8, min(tm_max, (avail // per_row) // 8 * 8))

    n_tiles = _cdiv(m, tm_cap)
    # v7x megacore: ensure the "parallel" row axis has >= 2 grid steps when
    # there are enough rows to split, so both TensorCores get a share.
    if n_tiles == 1 and m >= 256:
        n_tiles = 2
    # Balance the tail: tm ~= ceil(m / n_tiles) rounded to the sublane (8),
    # so row over-padding is at most a few sublanes per tile.
    tm = _round_up(_cdiv(m, n_tiles), 8)
    m_pad = n_tiles * tm
    return tm, m_pad, n_tiles, weight_bytes, per_row


def adapter_forward(x, w1_pt, w2_pt, *, tm_max=512):
    """Pallas implementation of Adapter.forward.

    x     : (..., c_in)          f32 or bf16
    w1_pt : (c_in // reduction, c_in)  -- PyTorch nn.Linear weight (out, in)
    w2_pt : (c_in, c_in // reduction)
    """
    orig_shape = x.shape
    c_in = orig_shape[-1]
    hidden = w1_pt.shape[0]

    x2d = x.reshape(-1, c_in)
    m = x2d.shape[0]

    # Lane-dense feature dims (multiples of 128).
    c_pad = _round_up(c_in, 128)
    h_pad = _round_up(hidden, 128)

    x_itemsize = x2d.dtype.itemsize
    w_itemsize = w1_pt.dtype.itemsize
    out_itemsize = x_itemsize

    vmem_budget = 16 * 1024 * 1024   # fits default scoped VMEM on v5e/v6e/v7x
    tm, m_pad, n_tiles, weight_bytes, per_row = _choose_row_tiling(
        m, c_pad, h_pad, x_itemsize, w_itemsize, out_itemsize,
        vmem_budget, tm_max)

    # Pre-transpose the (tiny) weights once in the wrapper so the kernel sees
    # a standard (M,K)x(K,N) contraction; pad features only if needed.
    w1t = w1_pt.T            # (c_in, hidden)
    w2t = w2_pt.T            # (hidden, c_in)
    if (c_pad, h_pad) != (c_in, hidden):
        w1t = jnp.pad(w1t, ((0, c_pad - c_in), (0, h_pad - hidden)))
        w2t = jnp.pad(w2t, ((0, h_pad - hidden), (0, c_pad - c_in)))

    # Only materialize a padded activation copy when padding is required
    # (common c_in % 128 == 0, m % tm == 0 cases skip the HBM round trip).
    padded = (m_pad, c_pad) != (m, c_in)
    if padded:
        x2d = jnp.pad(x2d, ((0, m_pad - m), (0, c_pad - c_in)))

    grid = (n_tiles,)

    bytes_accessed = (
        m_pad * c_pad * x_itemsize
        + w1t.size * w_itemsize + w2t.size * w_itemsize
        + m_pad * c_pad * out_itemsize)
    cost = pl.CostEstimate(
        flops=4 * m_pad * c_pad * h_pad,   # two matmuls, 2*M*K*N each
        transcendentals=0,
        bytes_accessed=bytes_accessed)

    vmem_need = weight_bytes + tm * per_row
    vmem_limit = int(min(max(32 * 1024 * 1024, vmem_need + (8 << 20)),
                         64 * 1024 * 1024))

    out2d = pl.pallas_call(
        _adapter_kernel,
        out_shape=jax.ShapeDtypeStruct((m_pad, c_pad), x.dtype),
        grid_spec=pltpu.PrefetchScalarGridSpec(
            num_scalar_prefetch=0,
            grid=grid,
            in_specs=[
                pl.BlockSpec((tm, c_pad), lambda i: (i, 0)),      # x tiles
                pl.BlockSpec((c_pad, h_pad), lambda i: (0, 0)),   # W1^T resident
                pl.BlockSpec((h_pad, c_pad), lambda i: (0, 0)),   # W2^T resident
            ],
            out_specs=pl.BlockSpec((tm, c_pad), lambda i: (i, 0)),
        ),
        compiler_params=pltpu.CompilerParams(
            dimension_semantics=("parallel",),
            vmem_limit_bytes=vmem_limit,
        ),
        cost_estimate=cost,
    )(x2d, w1t, w2t)

    if padded:
        out2d = out2d[:m, :c_in]
    return out2d.reshape(orig_shape)


if __name__ == "__main__":
    # Small shapes consistent with the module: tokens of width c_in.
    batch, seq, c_in, reduction = 2, 8, 32, 4
    hidden = c_in // reduction

    key = jax.random.PRNGKey(0)
    kx, k1, k2 = jax.random.split(key, 3)

    x = jax.random.normal(kx, (batch, seq, c_in), dtype=jnp.float32)
    # Deterministic synthetic weights in PyTorch nn.Linear layout (out, in).
    w1_pt = jax.random.normal(k1, (hidden, c_in), dtype=jnp.float32) * 0.1
    w2_pt = jax.random.normal(k2, (c_in, hidden), dtype=jnp.float32) * 0.1

    # f32 path: tight check against the pure-JAX reference.
    y = jax.block_until_ready(adapter_forward(x, w1_pt, w2_pt))
    ref = jnp.maximum(jnp.maximum(x @ w1_pt.T, 0.0) @ w2_pt.T, 0.0)
    assert y.shape == x.shape
    assert jnp.allclose(y, ref, atol=1e-5, rtol=1e-5)

    # bf16 I/O path (halves HBM bytes for this bandwidth-bound kernel; f32
    # accumulation inside): loose check against an f32 reference.
    xb = x.astype(jnp.bfloat16)
    w1b = w1_pt.astype(jnp.bfloat16)
    w2b = w2_pt.astype(jnp.bfloat16)
    yb = jax.block_until_ready(adapter_forward(xb, w1b, w2b))
    refb = jnp.maximum(
        jnp.maximum(xb.astype(jnp.float32) @ w1b.T.astype(jnp.float32), 0.0)
        @ w2b.T.astype(jnp.float32), 0.0)
    assert yb.dtype == jnp.bfloat16
    assert jnp.allclose(yb.astype(jnp.float32), refb, atol=3e-2, rtol=3e-2)

    print("KERNEL_OK")
</pallas_src>

<mosaic_0001>
module attributes {stable_mosaic.version = 11 : i64} {
  func.func @_adapter_kernel(%arg0: i32, %arg1: memref<16x128xf32, #tpu.memory_space<vmem>>, %arg2: memref<128x128xf32, #tpu.memory_space<vmem>>, %arg3: memref<128x128xf32, #tpu.memory_space<vmem>>, %arg4: memref<16x128xf32, #tpu.memory_space<vmem>>) attributes {dimension_semantics = [#tpu.dimension_semantics<parallel>], iteration_bounds = array<i64: 1>, scalar_prefetch = 0 : i64, scratch_operands = 0 : i64, tpu.core_type = #tpu.core_type<tc>, window_params = [{transform_indices = @transform_0, window_bounds = array<i64: 16, 128>}, {pipeline_mode = #tpu.pipeline_mode<synchronous>, transform_indices = @transform_1, window_bounds = array<i64: 128, 128>}, {pipeline_mode = #tpu.pipeline_mode<synchronous>, transform_indices = @transform_2, window_bounds = array<i64: 128, 128>}, {transform_indices = @transform_3, window_bounds = array<i64: 16, 128>}]} {
    %c0 = arith.constant 0 : index
    %c0_0 = arith.constant 0 : index
    %0 = vector.load %arg1[%c0, %c0_0] : memref<16x128xf32, #tpu.memory_space<vmem>>, vector<16x128xf32>
    %c0_1 = arith.constant 0 : index
    %c0_2 = arith.constant 0 : index
    %1 = vector.load %arg2[%c0_1, %c0_2] : memref<128x128xf32, #tpu.memory_space<vmem>>, vector<128x128xf32>
    %cst = arith.constant dense<0.000000e+00> : vector<16x128xf32>
    %2 = tpu.matmul %0, %1, %cst {dimension_numbers = #tpu.dot_dimension_numbers<[1], [0], [0], [1], [0, 0, 1, 1], [], []>} : vector<16x128xf32>, vector<128x128xf32>, vector<16x128xf32> -> vector<16x128xf32>
    %cst_3 = arith.constant 0.000000e+00 : f32
    %3 = vector.broadcast %cst_3 : f32 to vector<16x128xf32>
    %4 = arith.maximumf %2, %3 : vector<16x128xf32>
    %c0_4 = arith.constant 0 : index
    %c0_5 = arith.constant 0 : index
    %5 = vector.load %arg3[%c0_4, %c0_5] : memref<128x128xf32, #tpu.memory_space<vmem>>, vector<128x128xf32>
    %cst_6 = arith.constant dense<0.000000e+00> : vector<16x128xf32>
    %6 = tpu.matmul %4, %5, %cst_6 {dimension_numbers = #tpu.dot_dimension_numbers<[1], [0], [0], [1], [0, 0, 1, 1], [], []>} : vector<16x128xf32>, vector<128x128xf32>, vector<16x128xf32> -> vector<16x128xf32>
    %cst_7 = arith.constant 0.000000e+00 : f32
    %7 = vector.broadcast %cst_7 : f32 to vector<16x128xf32>
    %8 = arith.maximumf %6, %7 : vector<16x128xf32>
    %c0_8 = arith.constant 0 : index
    %c0_9 = arith.constant 0 : index
    %9 = vector.load %arg4[%c0_8, %c0_9] : memref<16x128xf32, #tpu.memory_space<vmem>>, vector<16x128xf32>
    tpu.vector_store %arg4[%c0_8, %c0_9], %8 {strides = array<i32>} : memref<16x128xf32, #tpu.memory_space<vmem>>, vector<16x128xf32>,
    return
  }
  func.func @transform_0(%arg0: i32) -> (i32, i32) {
    %c0_i32 = arith.constant 0 : i32
    %c0_i32_0 = arith.constant 0 : i32
    return %arg0, %c0_i32 : i32, i32
  }
  func.func @transform_1(%arg0: i32) -> (i32, i32) {
    %c0_i32 = arith.constant 0 : i32
    %c0_i32_0 = arith.constant 0 : i32
    %c0_i32_1 = arith.constant 0 : i32
    return %c0_i32, %c0_i32_0 : i32, i32
  }
  func.func @transform_2(%arg0: i32) -> (i32, i32) {
    %c0_i32 = arith.constant 0 : i32
    %c0_i32_0 = arith.constant 0 : i32
    %c0_i32_1 = arith.constant 0 : i32
    return %c0_i32, %c0_i32_0 : i32, i32
  }
  func.func @transform_3(%arg0: i32) -> (i32, i32) {
    %c0_i32 = arith.constant 0 : i32
    %c0_i32_0 = arith.constant 0 : i32
    return %arg0, %c0_i32 : i32, i32
  }
}

</mosaic_0001>

<bundles_post_ra>
// kernel: tpu_custom_call.1
= control target key start
LH: loop header
LB: loop body
LE: loop exit
PB: predicated region body
PF: predicated region fallthrough
CT: control target
= control target key end

     0   :  { %8 = vsyncpa [#allocation3], 0  ;;  %s627_s0 = inlined_call_operand.hbm [shape: f32[16,128], index: 0, kind: input, shape index: {}]   ;;  %s628_s1 = inlined_call_operand.hbm [shape: f32[128,128], index: 1, kind: input, shape index: {}]   ;;  %s629_s2 = inlined_call_operand.hbm [shape: f32[128,128], index: 2, kind: input, shape index: {}]   ;;  %s630_s3 = inlined_call_operand.hbm [shape: f32[16,128], index: 3, kind: output, shape index: {}]  }
   0x1   :  { %9 = vsyncpa [#allocation6], 0 }
   0x2   :  { %10 = vsyncpa [#allocation4], 0  ;;  %s534_s12 = smov [#allocation5]   ;;  %s535_s14 = smov [#allocation2]  }
   0x3   :  { %s28_s13 = sshll.u32 %s534_s12, 4  ;;  %s16_s15 = sshll.u32 %s535_s14, 4  ;;  %s29_s13 = int_to_ptr.vmem [resolvable:$true] %s28_s13  ;;  %s560_s15 = int_to_ptr.vmem [resolvable:$true] %s16_s15 }
   0x4   :  { %s440_s18 = scalar_lea.hbm %s628_s1, 2048 }
   0x5   :  { %p441_p0 = scmp.ne.s32.totalorder %s628_s1, %s440_s18  ;;  %p444_p1 = scmp.lt.u32.totalorder %s440_s18, %s628_s1 }
   0x7   :  { %p446_p2 = pnand %p444_p1, %p441_p0 }
   0x9   :  { %449 = shalt.err (!%p446_p2)
}
   0xa   :  { %s450_s23 = scalar_lea.vmem %s29_s13, 2048  ;;  %p455_p4 = scmp.lt.s32.totalorder %s29_s13, %s29_s13 }
   0xb   :  { %p451_p3 = scmp.ne.s32.totalorder %s29_s13, %s450_s23  ;;  %p456_p5 = scmp.lt.s32.totalorder %s450_s23, %s450_s23 }
   0xd   :  { %p457_p6 = por %p456_p5, %p455_p4 }
   0xf   :  { %p458_p7 = pnand %p457_p6, %p451_p3 }
  0x11   :  { %461 = shalt.err (!%p458_p7)
}
  0x12   :  { %s536_s24 = smov 128   ;;  %s537_s25 = smov 8  }
  0x13   :  { %34 = dma.hbm_to_vmem [thread:$0]  %s628_s1, 2048, %s29_s13, [#allocation6], %s536_s24, %s536_s24, %s537_s25  }
  0x14   :  { %s462_s30 = scalar_lea.hbm %s627_s0, 256 }
  0x15   :  { %p463_p8 = scmp.ne.s32.totalorder %s627_s0, %s462_s30  ;;  %p466_p9 = scmp.lt.u32.totalorder %s462_s30, %s627_s0 }
  0x17   :  { %p468_p10 = pnand %p466_p9, %p463_p8 }
  0x19   :  { %471 = shalt.err (!%p468_p10)
}
  0x1a   :  { %s472_s8 = scalar_lea.vmem %s560_s15, 256  ;;  %p477_p12 = scmp.lt.s32.totalorder %s560_s15, %s560_s15 }
  0x1b   :  { %p473_p11 = scmp.ne.s32.totalorder %s560_s15, %s472_s8  ;;  %p478_p13 = scmp.lt.s32.totalorder %s472_s8, %s472_s8 }
  0x1d   :  { %p479_p0 = por %p478_p13, %p477_p12 }
  0x1f   :  { %p480_p1 = pnand %p479_p0, %p473_p11 }
  0x21   :  { %483 = shalt.err (!%p480_p1)
}
  0x22   :  { %22 = dma.hbm_to_vmem [thread:$0]  %s627_s0, 256, %s560_s15, [#allocation3], %s536_s24, %s536_s24, %s537_s25  }
  0x23   :  { %s538_s10 = smov [#allocation7]   ;;  %s484_s14 = scalar_lea.hbm %s629_s2, 2048 }
  0x24   :  { %s40_s11 = sshll.u32 %s538_s10, 4  ;;  %p485_p2 = scmp.ne.s32.totalorder %s629_s2, %s484_s14  ;;  %s41_s11 = int_to_ptr.vmem [resolvable:$true] %s40_s11 }
  0x25   :  { %p488_p3 = scmp.lt.u32.totalorder %s484_s14, %s629_s2 }
  0x27   :  { %p490_p4 = pnand %p488_p3, %p485_p2 }
  0x29   :  { %493 = shalt.err (!%p490_p4)
}
  0x2a   :  { %s494_s20 = scalar_lea.vmem %s41_s11, 2048  ;;  %p499_p6 = scmp.lt.s32.totalorder %s41_s11, %s41_s11 }
  0x2b   :  { %p495_p5 = scmp.ne.s32.totalorder %s41_s11, %s494_s20  ;;  %p500_p7 = scmp.lt.s32.totalorder %s494_s20, %s494_s20 }
  0x2d   :  { %p501_p8 = por %p500_p7, %p499_p6 }
  0x2f   :  { %p502_p9 = pnand %p501_p8, %p495_p5 }
  0x31   :  { %505 = shalt.err (!%p502_p9)
}
  0x32   :  { %46 = dma.hbm_to_vmem [thread:$0]  %s629_s2, 2048, %s41_s11, [#allocation6], %s536_s24, %s536_s24, %s537_s25  }
  0x33   :  { %528 = dma.done.wait [#allocation3], 256  }
  0x34   :  { %529 = vsyncadd [#allocation3], 4294967040 }
  0x35   :  { %530 = dma.done.wait [#allocation6], 4096  }
  0x36   :  { %531 = vsyncadd [#allocation6], 4294963200  ;;  %v58_v0 = vld [vmem:[#allocation5] sm:$0xff]  ;;  %v59_v1 = vld [vmem:[#allocation5 + $0x8] sm:$0xff]  ;;  %s539_s2 = smov [#allocation8]  }
  0x37   :  { %v60_v2 = vld [vmem:[#allocation5 + $0x10] sm:$0xff]  ;;  %v370_v3 = vpack.c.bf16 %v59_v1, %v58_v0  ;;  %v61_v4 = vld [vmem:[#allocation5 + $0x18] sm:$0xff]  ;;  %v62_v6 = vld [vmem:[#allocation5 + $0x20] sm:$0xff]  ;;  %s251_s21 = sshll.u32 %s539_s2, 4  ;;  %s252_s21 = int_to_ptr.vmem [resolvable:$true] %s251_s21 }
  0x38   :  { %v374_v5 = vpack.c.bf16 %v61_v4, %v60_v2  ;;  %v63_v7 = vld [vmem:[#allocation5 + $0x28] sm:$0xff]  ;;  %v64_v9 = vld [vmem:[#allocation5 + $0x30] sm:$0xff]  ;;  %v65_v10 = vld [vmem:[#allocation5 + $0x38] sm:$0xff]  ;;  %s506_s22 = scalar_lea.vmem %s252_s21, 256  ;;  %p511_p11 = scmp.lt.s32.totalorder %s252_s21, %s252_s21 }
  0x39   :  { %371 = vmatprep.subr.bf16.mxu0 %v370_v3  ;;  %v378_v8 = vpack.c.bf16 %v63_v7, %v62_v6  ;;  %v56_v11 = vld [vmem:[#allocation2] sm:$0xff]  ;;  %v151_v12 = vld [vmem:[#allocation7] sm:$0xff]  ;;  %v152_v13 = vld [vmem:[#allocation7 + $0x8] sm:$0xff]  ;;  %v382_v20 = vpack.c.bf16 %v65_v10, %v64_v9  ;;  %p507_p10 = scmp.ne.s32.totalorder %s252_s21, %s506_s22  ;;  %p512_p12 = scmp.lt.s32.totalorder %s506_s22, %s506_s22 }
  0x3a   :  { %373 = vmatpush3.bf16.msra.mxu0 %v370_v3  ;;  %332 = vmatprep.mubr.f32.mxu0 %v56_v11  ;;  %v153_v14 = vld [vmem:[#allocation7 + $0x10] sm:$0xff]  ;;  %v402_v15 = vpack.c.bf16 %v152_v13, %v151_v12  ;;  %v154_v16 = vld [vmem:[#allocation7 + $0x18] sm:$0xff]  ;;  %v155_v18 = vld [vmem:[#allocation7 + $0x20] sm:$0xff] }
  0x3b   :  { %375 = vmatprep.subr.bf16.mxu0 %v374_v5  ;;  %v406_v17 = vpack.c.bf16 %v154_v16, %v153_v14  ;;  %v156_v19 = vld [vmem:[#allocation7 + $0x28] sm:$0xff]  ;;  %v66_v21 = vld [vmem:[#allocation5 + $0x40] sm:$0xff]  ;;  %v157_v24 = vld [vmem:[#allocation7 + $0x30] sm:$0xff]  ;;  %p513_p13 = por %p512_p12, %p511_p11 }
  0x3c   :  { %403 = vmatprep.subr.bf16.mxu1 %v402_v15  ;;  %v67_v22 = vld [vmem:[#allocation5 + $0x48] sm:$0xff]  ;;  %v410_v23 = vpack.c.bf16 %v156_v19, %v155_v18  ;;  %v158_v25 = vld [vmem:[#allocation7 + $0x38] sm:$0xff]  ;;  %v68_v27 = vld [vmem:[#allocation5 + $0x50] sm:$0xff] }
  0x3d   :  { %405 = vmatpush3.bf16.msra.mxu1 %v402_v15  ;;  %v386_v26 = vpack.c.bf16 %v67_v22, %v66_v21  ;;  %v69_v28 = vld [vmem:[#allocation5 + $0x58] sm:$0xff]  ;;  %v414_v29 = vpack.c.bf16 %v158_v25, %v157_v24  ;;  %v159_v30 = vld [vmem:[#allocation7 + $0x40] sm:$0xff]  ;;  %v160_v31 = vld [vmem:[#allocation7 + $0x48] sm:$0xff]  ;;  %p514_p0 = pnand %p513_p13, %p507_p10 }
  0x3e   :  { %377 = vmatpush3.bf16.msra.mxu0 %v374_v5  ;;  %407 = vmatprep.subr.bf16.mxu1 %v406_v17  ;;  %v390_v32 = vpack.c.bf16 %v69_v28, %v68_v27  ;;  %v70_v33 = vld [vmem:[#allocation5 + $0x60] sm:$0xff]  ;;  %v71_v34 = vld [vmem:[#allocation5 + $0x68] sm:$0xff]  ;;  %v418_v35 = vpack.c.bf16 %v160_v31, %v159_v30  ;;  %v161_v36 = vld [vmem:[#allocation7 + $0x50] sm:$0xff] }
  0x3f   :  { %379 = vmatprep.subr.bf16.mxu0 %v378_v8  ;;  %v162_v37 = vld [vmem:[#allocation7 + $0x58] sm:$0xff]  ;;  %v394_v38 = vpack.c.bf16 %v71_v34, %v70_v33  ;;  %v72_v39 = vld [vmem:[#allocation5 + $0x70] sm:$0xff]  ;;  %v163_v42 = vld [vmem:[#allocation7 + $0x60] sm:$0xff] }
  0x40   :  { %v73_v40 = vld [vmem:[#allocation5 + $0x78] sm:$0xff]  ;;  %v422_v41 = vpack.c.bf16 %v162_v37, %v161_v36  ;;  %v164_v43 = vld [vmem:[#allocation7 + $0x68] sm:$0xff]  ;;  %v165_v47 = vld [vmem:[#allocation7 + $0x70] sm:$0xff] }
  0x41   :  { %409 = vmatpush3.bf16.msra.mxu1 %v406_v17  ;;  %v398_v44 = vpack.c.bf16 %v73_v40, %v72_v39  ;;  %v426_v45 = vpack.c.bf16 %v164_v43, %v163_v42  ;;  %v57_v46 = vld [vmem:[#allocation2 + $0x8] sm:$0xff] }
  0x42   :  { %381 = vmatpush3.bf16.msra.mxu0 %v378_v8  ;;  %411 = vmatprep.subr.bf16.mxu1 %v410_v23  ;;  %v166_v48 = vld [vmem:[#allocation7 + $0x78] sm:$0xff] }
  0x43   :  { %383 = vmatprep.subr.bf16.mxu0 %v382_v20  ;;  %v430_v49 = vpack.c.bf16 %v166_v48, %v165_v47 }
  0x45   :  { %413 = vmatpush3.bf16.msra.mxu1 %v410_v23 }
  0x46   :  { %385 = vmatpush3.bf16.msra.mxu0 %v382_v20  ;;  %415 = vmatprep.subr.bf16.mxu1 %v414_v29 }
  0x47   :  { %387 = vmatprep.subr.bf16.mxu0 %v386_v26 }
  0x49   :  { %417 = vmatpush3.bf16.msra.mxu1 %v414_v29 }
  0x4a   :  { %389 = vmatpush3.bf16.msra.mxu0 %v386_v26  ;;  %419 = vmatprep.subr.bf16.mxu1 %v418_v35 }
  0x4b   :  { %391 = vmatprep.subr.bf16.mxu0 %v390_v32 }
  0x4d   :  { %421 = vmatpush3.bf16.msra.mxu1 %v418_v35 }
  0x4e   :  { %393 = vmatpush3.bf16.msra.mxu0 %v390_v32  ;;  %423 = vmatprep.subr.bf16.mxu1 %v422_v41 }
  0x4f   :  { %395 = vmatprep.subr.bf16.mxu0 %v394_v38 }
  0x51   :  { %425 = vmatpush3.bf16.msra.mxu1 %v422_v41 }
  0x52   :  { %397 = vmatpush3.bf16.msra.mxu0 %v394_v38  ;;  %427 = vmatprep.subr.bf16.mxu1 %v426_v45 }
  0x53   :  { %399 = vmatprep.subr.bf16.mxu0 %v398_v44 }
  0x55   :  { %429 = vmatpush3.bf16.msra.mxu1 %v426_v45 }
  0x56   :  { %401 = vmatpush3.bf16.msra.mxu0 %v398_v44  ;;  %431 = vmatprep.subr.bf16.mxu1 %v430_v49 }
  0x59   :  { %333 = vmatmul.mubr.f32.vlgmr.msra.gmra.mrb[0].mxu0 %v57_v46  ;;  %433 = vmatpush3.bf16.msra.mxu1 %v430_v49 }
 0x12c   :  { %v334_v50 = vpop.f32.mrb[0].mxu0 }
 0x12d   :  { %v140_v51 = vpop.f32.mrb[1].mxu0  ;;  %v150_v53 = vmax.f32 %v334_v50, 0.0 }
 0x12e   :  { %v149_v52 = vmax.f32 %v140_v51, 0.0 }
 0x130   :  { %367 = vmatprep.mubr.f32.mxu1 %v149_v52 }
 0x131   :  { %368 = vmatmul.mubr.f32.vlgmr.msra.gmra.mrb[0].mxu1 %v150_v53 }
 0x204   :  { %v369_v54 = vpop.f32.mrb[0].mxu1 }
 0x205   :  { %v243_v55 = vmax.f32 %v369_v54, 0.0  ;;  %v233_v56 = vpop.f32.mrb[1].mxu1 }
 0x206   :  { %v242_v57 = vmax.f32 %v233_v56, 0.0 }
 0x207   :  { %245 = vst [vmem:[#allocation8 + $0x8] sm:$0xff] %v243_v55 }
 0x208   :  { %244 = vst [vmem:[#allocation8] sm:$0xff] %v242_v57 }
 0x209   :  { %517 = shalt.err (!%p514_p0)
}
 0x20a   :  { %s518_s27 = scalar_lea.hbm %s630_s3, 256 }
 0x20b   :  { %p519_p1 = scmp.ne.s32.totalorder %s630_s3, %s518_s27  ;;  %p522_p2 = scmp.lt.u32.totalorder %s518_s27, %s630_s3 }
 0x20d   :  { %p524_p3 = pnand %p522_p2, %p519_p1 }
 0x20f   :  { %527 = shalt.err (!%p524_p3)
}
 0x210   :  { %257 = dma.vmem_to_hbm [thread:$0]  %s252_s21, 256, %s630_s3, [#allocation4], %s536_s24, %s536_s24, %s537_s25  }
 0x211   :  { %532 = dma.done.wait [#allocation4], 256  }
 0x212   :  { %533 = vsyncadd [#allocation4], 4294967040 }
 0x213   :  { %261 = vsyncpa [#allocation3], 1 }
 0x214   :  { %262 = vsyncpa [#allocation6], 1 }
 0x215   :  { %263 = vsyncpa [#allocation4], 1 }

</bundles_post_ra>
